<compile_context>
chip_gen: v7x
topology: tpu7x:2x2x1
jax: 0.10.0
libtpu: 0.0.40
codegen_flags: <defaults>
</compile_context>

<pallas_src>
import functools

import jax
import jax.numpy as jnp
from jax.experimental import pallas as pl
from jax.experimental.pallas import tpu as pltpu

LN_EPS = 1e-5  # torch.nn.LayerNorm default


def _batch_label_encoder_kernel(idx_ref, table_ref, gamma_ref, beta_ref, out_ref):
    # idx_ref:   (T, 1) int32   -- label ids for this tile of tokens
    # table_ref: (V, D) float32 -- full embedding table (resident in VMEM)
    # gamma_ref: (1, D) float32 -- LayerNorm weight
    # beta_ref:  (1, D) float32 -- LayerNorm bias
    # out_ref:   (T, D)         -- output tile (f32 by default, optionally bf16)
    idx = idx_ref[...]                                    # (T, 1)
    table = table_ref[...]                                # (V, D) f32
    t, v = idx.shape[0], table.shape[0]

    # Embedding lookup as one-hot matmul (MXU path). Fine while V is small;
    # for large V switch to a scalar-prefetch row-gather instead.
    iota_v = jax.lax.broadcasted_iota(jnp.int32, (t, v), 1)
    onehot = (iota_v == idx).astype(jnp.float32)          # (T, V)
    emb = jnp.dot(onehot, table, preferred_element_type=jnp.float32)  # (T, D) f32

    # LayerNorm over the embedding dim (f32 math).
    mean = jnp.mean(emb, axis=-1, keepdims=True)
    cen = emb - mean
    var = jnp.mean(cen * cen, axis=-1, keepdims=True)
    inv = jax.lax.rsqrt(var + LN_EPS)
    y = cen * inv * gamma_ref[...] + beta_ref[...]
    out_ref[...] = y.astype(out_ref.dtype)


@functools.partial(jax.jit, static_argnames=("tile_tokens", "out_dtype"))
def batch_label_encoder(x, emb_table, gamma, beta, *, tile_tokens=256,
                        out_dtype=jnp.float32):
    """x: (B, S) int ids; emb_table: (V, D); gamma/beta: (D,) -> (B, S, D)."""
    b, s = x.shape
    v, d = emb_table.shape
    n = b * s

    # Effective token tile: large (default 256) for real workloads, but never
    # bigger than N rounded up to a sublane multiple (8 for f32).
    tile = max(8, min(int(tile_tokens), pl.cdiv(n, 8) * 8))
    tile = (tile // 8) * 8
    n_pad = pl.cdiv(n, tile) * tile

    idx = x.reshape(n).astype(jnp.int32)
    if n_pad != n:
        # Cheap pad (no scatter); padded ids map to row 0 and are sliced off below.
        idx = jnp.pad(idx, (0, n_pad - n))
    idx = idx.reshape(n_pad, 1)

    table_f32 = emb_table.astype(jnp.float32)
    gamma2 = gamma.reshape(1, d).astype(jnp.float32)
    beta2 = beta.reshape(1, d).astype(jnp.float32)

    # Scoped-VMEM budget: resident table (x2 for buffering slack) + double-buffered
    # id/output tiles + gamma/beta + margin.  Clamped to [32 MiB, 64 MiB] so it is
    # always >= the default scoped limit yet never exceeds v7x's 64 MiB physical VMEM.
    out_elt = jnp.dtype(out_dtype).itemsize
    vmem_bytes = (2 * v * d * 4
                  + 2 * tile * 4
                  + 2 * tile * d * out_elt
                  + 4 * d * 4
                  + (1 << 20))
    vmem_limit = int(min(64 << 20, max(vmem_bytes, 32 << 20)))

    grid = (n_pad // tile,)
    out = pl.pallas_call(
        _batch_label_encoder_kernel,
        out_shape=jax.ShapeDtypeStruct((n_pad, d), out_dtype),
        grid_spec=pl.GridSpec(
            grid=grid,
            in_specs=[
                pl.BlockSpec((tile, 1), lambda t: (t, 0)),   # token ids
                pl.BlockSpec((v, d), lambda t: (0, 0)),      # full embedding table
                pl.BlockSpec((1, d), lambda t: (0, 0)),      # gamma
                pl.BlockSpec((1, d), lambda t: (0, 0)),      # beta
            ],
            out_specs=pl.BlockSpec((tile, d), lambda t: (t, 0)),
        ),
        compiler_params=pltpu.CompilerParams(
            dimension_semantics=("parallel",),               # megacore split on v7x
            vmem_limit_bytes=vmem_limit,
        ),
    )(idx, table_f32, gamma2, beta2)

    if n_pad != n:
        out = out[:n]
    return out.reshape(b, s, d)


def _reference(x, emb_table, gamma, beta):
    emb = emb_table[x]                                     # (B, S, D)
    mean = jnp.mean(emb, axis=-1, keepdims=True)
    var = jnp.mean((emb - mean) ** 2, axis=-1, keepdims=True)
    return (emb - mean) * jax.lax.rsqrt(var + LN_EPS) * gamma + beta


if __name__ == "__main__":
    # Small shapes consistent with the module's forward:
    #   num_embeddings (V) = 16, embedding_dim (D) = 128, batch = 2, seq = 8.
    V, D = 16, 128
    B, S = 2, 8
    padding_idx = 0

    key = jax.random.PRNGKey(0)
    k_emb, k_x = jax.random.split(key)

    # Deterministic parameter init (nn.Embedding ~ N(0,1); padding row zeroed;
    # LayerNorm: weight=1, bias=0).
    emb_table = jax.random.normal(k_emb, (V, D), dtype=jnp.float32)
    emb_table = emb_table.at[padding_idx].set(0.0)
    gamma = jnp.ones((D,), jnp.float32)
    beta = jnp.zeros((D,), jnp.float32)

    x = jax.random.randint(k_x, (B, S), 0, V, dtype=jnp.int32)

    out = batch_label_encoder(x, emb_table, gamma, beta)
    out = jax.block_until_ready(out)

    ref = _reference(x, emb_table, gamma, beta)
    assert out.shape == (B, S, D)
    assert jnp.allclose(out, ref, atol=1e-4, rtol=1e-4), "mismatch vs reference"

    print("KERNEL_OK")
</pallas_src>

<mosaic_0001>
module attributes {stable_mosaic.version = 11 : i64} {
  func.func @_batch_label_encoder_kernel(%arg0: i32, %arg1: memref<16x1xi32, #tpu.memory_space<vmem>>, %arg2: memref<16x128xf32, #tpu.memory_space<vmem>>, %arg3: memref<1x128xf32, #tpu.memory_space<vmem>>, %arg4: memref<1x128xf32, #tpu.memory_space<vmem>>, %arg5: memref<16x128xf32, #tpu.memory_space<vmem>>) attributes {dimension_semantics = [#tpu.dimension_semantics<parallel>], iteration_bounds = array<i64: 1>, scalar_prefetch = 0 : i64, scratch_operands = 0 : i64, tpu.core_type = #tpu.core_type<tc>, window_params = [{transform_indices = @transform_0, window_bounds = array<i64: 16, 1>}, {pipeline_mode = #tpu.pipeline_mode<synchronous>, transform_indices = @transform_1, window_bounds = array<i64: 16, 128>}, {pipeline_mode = #tpu.pipeline_mode<synchronous>, transform_indices = @transform_2, window_bounds = array<i64: 1, 128>}, {pipeline_mode = #tpu.pipeline_mode<synchronous>, transform_indices = @transform_3, window_bounds = array<i64: 1, 128>}, {transform_indices = @transform_4, window_bounds = array<i64: 16, 128>}]} {
    %c0 = arith.constant 0 : index
    %c0_0 = arith.constant 0 : index
    %0 = vector.load %arg1[%c0, %c0_0] : memref<16x1xi32, #tpu.memory_space<vmem>>, vector<16x1xi32>
    %c0_1 = arith.constant 0 : index
    %c0_2 = arith.constant 0 : index
    %1 = vector.load %arg2[%c0_1, %c0_2] : memref<16x128xf32, #tpu.memory_space<vmem>>, vector<16x128xf32>
    %2 = tpu.iota {dimensions = array<i32: 1>} : vector<16x16xi32>
    %3 = vector.broadcast %0 : vector<16x1xi32> to vector<16x16xi32>
    %4 = arith.cmpi eq, %2, %3 : vector<16x16xi32>
    %5 = arith.extui %4 : vector<16x16xi1> to vector<16x16xi32>
    %6 = arith.sitofp %5 : vector<16x16xi32> to vector<16x16xf32>
    %cst = arith.constant dense<0.000000e+00> : vector<16x128xf32>
    %7 = tpu.matmul %6, %1, %cst {dimension_numbers = #tpu.dot_dimension_numbers<[1], [0], [0], [1], [0, 0, 1, 1], [], []>} : vector<16x16xf32>, vector<16x128xf32>, vector<16x128xf32> -> vector<16x128xf32>
    %cst_3 = arith.constant dense<0.000000e+00> : vector<16xf32>
    %8 = vector.multi_reduction <add>, %7, %cst_3 [1] : vector<16x128xf32> to vector<16xf32>
    %9 = vector.shape_cast %8 : vector<16xf32> to vector<16x1xf32>
    %cst_4 = arith.constant 1.280000e+02 : f32
    %10 = vector.broadcast %cst_4 : f32 to vector<16x1xf32>
    %11 = arith.divf %9, %10 : vector<16x1xf32>
    %12 = vector.broadcast %11 : vector<16x1xf32> to vector<16x128xf32>
    %13 = arith.subf %7, %12 : vector<16x128xf32>
    %14 = arith.mulf %13, %13 : vector<16x128xf32>
    %cst_5 = arith.constant dense<0.000000e+00> : vector<16xf32>
    %15 = vector.multi_reduction <add>, %14, %cst_5 [1] : vector<16x128xf32> to vector<16xf32>
    %16 = vector.shape_cast %15 : vector<16xf32> to vector<16x1xf32>
    %cst_6 = arith.constant 1.280000e+02 : f32
    %17 = vector.broadcast %cst_6 : f32 to vector<16x1xf32>
    %18 = arith.divf %16, %17 : vector<16x1xf32>
    %cst_7 = arith.constant 9.99999974E-6 : f32
    %19 = vector.broadcast %cst_7 : f32 to vector<16x1xf32>
    %20 = arith.addf %18, %19 : vector<16x1xf32>
    %21 = math.rsqrt %20 : vector<16x1xf32>
    %22 = vector.broadcast %21 : vector<16x1xf32> to vector<16x128xf32>
    %23 = arith.mulf %13, %22 : vector<16x128xf32>
    %c0_8 = arith.constant 0 : index
    %c0_9 = arith.constant 0 : index
    %24 = vector.load %arg3[%c0_8, %c0_9] : memref<1x128xf32, #tpu.memory_space<vmem>>, vector<1x128xf32>
    %25 = vector.broadcast %24 : vector<1x128xf32> to vector<16x128xf32>
    %26 = arith.mulf %23, %25 : vector<16x128xf32>
    %c0_10 = arith.constant 0 : index
    %c0_11 = arith.constant 0 : index
    %27 = vector.load %arg4[%c0_10, %c0_11] : memref<1x128xf32, #tpu.memory_space<vmem>>, vector<1x128xf32>
    %28 = vector.broadcast %27 : vector<1x128xf32> to vector<16x128xf32>
    %29 = arith.addf %26, %28 : vector<16x128xf32>
    %c0_12 = arith.constant 0 : index
    %c0_13 = arith.constant 0 : index
    %30 = vector.load %arg5[%c0_12, %c0_13] : memref<16x128xf32, #tpu.memory_space<vmem>>, vector<16x128xf32>
    tpu.vector_store %arg5[%c0_12, %c0_13], %29 {strides = array<i32>} : memref<16x128xf32, #tpu.memory_space<vmem>>, vector<16x128xf32>,
    return
  }
  func.func @transform_0(%arg0: i32) -> (i32, i32) {
    %c0_i32 = arith.constant 0 : i32
    %c0_i32_0 = arith.constant 0 : i32
    return %arg0, %c0_i32 : i32, i32
  }
  func.func @transform_1(%arg0: i32) -> (i32, i32) {
    %c0_i32 = arith.constant 0 : i32
    %c0_i32_0 = arith.constant 0 : i32
    %c0_i32_1 = arith.constant 0 : i32
    return %c0_i32, %c0_i32_0 : i32, i32
  }
  func.func @transform_2(%arg0: i32) -> (i32, i32) {
    %c0_i32 = arith.constant 0 : i32
    %c0_i32_0 = arith.constant 0 : i32
    %c0_i32_1 = arith.constant 0 : i32
    return %c0_i32, %c0_i32_0 : i32, i32
  }
  func.func @transform_3(%arg0: i32) -> (i32, i32) {
    %c0_i32 = arith.constant 0 : i32
    %c0_i32_0 = arith.constant 0 : i32
    %c0_i32_1 = arith.constant 0 : i32
    return %c0_i32, %c0_i32_0 : i32, i32
  }
  func.func @transform_4(%arg0: i32) -> (i32, i32) {
    %c0_i32 = arith.constant 0 : i32
    %c0_i32_0 = arith.constant 0 : i32
    return %arg0, %c0_i32 : i32, i32
  }
}

</mosaic_0001>

<bundles_post_ra>
// kernel: batch_label_encoder.1
= control target key start
LH: loop header
LB: loop body
LE: loop exit
PB: predicated region body
PF: predicated region fallthrough
CT: control target
= control target key end

     0   :  { %s292_s0 = inlined_call_operand.vmem [shape: s32[16,1], index: 0, kind: input, shape index: {}]   ;;  %s293_s1 = inlined_call_operand.vmem [shape: f32[16,128], index: 1, kind: input, shape index: {}]   ;;  %s294_s2 = inlined_call_operand.vmem [shape: f32[1,128], index: 2, kind: input, shape index: {}]   ;;  %s295_s3 = inlined_call_operand.vmem [shape: f32[1,128], index: 3, kind: input, shape index: {}]   ;;  %s296_s4 = inlined_call_operand.hbm [shape: f32[16,128], index: 4, kind: output, shape index: {}]  }
   0x1   :  { %v18_v0 = vld [vmem:[%s292_s0] sm:$0xff] }
   0x2   :  { %9 = vsyncpa [#allocation3], 0  ;;  %v232_v1 = vmov 0   ;;  %v20_v2 = vld [vmem:[%s293_s1] sm:$0xff]  ;;  %v21_v3 = vld [vmem:[%s293_s1 + $0x8] sm:$0xff]  ;;  %v22_v6 = vlaneseq  ;;  %vm36_vm0 = vcmask 130048  }
   0x3   :  { %203 = vset.pattern.permute.xlu0 %v232_v1  ;;  %v194_v4 = vpack.c.bf16 %v21_v3, %v20_v2  ;;  %v19_v5 = vld [vmem:[%s292_s0 + $0x8] sm:$0xff]  ;;  %v233_v9 = vmov 0.0   ;;  %v181_v30 = vld [vmem:[%s294_s2] ss:$0 sm:$0xff]  ;;  %s234_s25 = smov [#allocation2]  }
   0x4   :  { %25 = vperm.xlu0 %203, %v18_v0   ;;  %v23_v7 = vand.u32 127, %v22_v6  ;;  %v182_v32 = vld [vmem:[%s295_s3] ss:$0 sm:$0xff]  ;;  %s166_s26 = sshll.u32 %s234_s25, 4  ;;  %s167_s26 = int_to_ptr.vmem [resolvable:$true] %s166_s26 }
   0x5   :  { %195 = vmatprep.subr.bf16.mxu0 %v194_v4  ;;  %s208_s27 = scalar_lea.vmem %s167_s26, 256  ;;  %p213_p1 = scmp.lt.s32.totalorder %s167_s26, %s167_s26 }
   0x6   :  { %197 = vmatpush3.bf16.msra.mxu0 %v194_v4  ;;  %p209_p0 = scmp.ne.s32.totalorder %s167_s26, %s208_s27  ;;  %p214_p2 = scmp.lt.s32.totalorder %s208_s27, %s208_s27 }
   0x8   :  { %28 = vperm.xlu0 %203, %v19_v5   ;;  %p215_p3 = por %p214_p2, %p213_p1 }
   0xa   :  { %p216_p4 = pnand %p215_p3, %p209_p0 }
  0x83   :  { %v26_v8 = vpop.permute.xlu0 %25 }
  0x84   :  { %vm30_vm1 = vcmp.eq.s32.totalorder %v23_v7, %v26_v8 }
  0x85   :  { %v177_v10 = vsel %vm30_vm1, 1.0, %v233_v9 }
  0x86   :  { %191 = vmatprep.mubr.msk.f32.mxu0 %vm36_vm0, %v177_v10 }
  0x87   :  { %v29_v11 = vpop.permute.xlu0 %28 }
  0x88   :  { %vm31_vm2 = vcmp.eq.s32.totalorder %v23_v7, %v29_v11 }
  0x89   :  { %v178_v12 = vsel %vm31_vm2, 1.0, %v233_v9 }
  0x8a   :  { %192 = vmatmul.mubr.msk.f32.vlgmr.msra.gmra.mrb[0].mxu0 %vm36_vm0, %v178_v12 }
 0x15d   :  { %v193_v13 = vpop.f32.mrb[0].mxu0 }
 0x15e   :  { %v109_v14 = vpop.f32.mrb[1].mxu0 }
 0x15f   :  { %118 = vadd.xlane.f32.xlu1 %v109_v14 }
 0x163   :  { %120 = vadd.xlane.f32.xlu1 %v193_v13 }
 0x1ec   :  { %v119_v15 = vpop.xlane.xlu1 %118 }
 0x1ed   :  { %v123_v16 = vmul.f32 0.0078125, %v119_v15 }
 0x1ef   :  { %v125_v17 = vsub.f32 %v109_v14, %v123_v16 }
 0x1f0   :  { %v121_v18 = vpop.xlane.xlu1 %120 }
 0x1f1   :  { %v124_v19 = vmul.f32 0.0078125, %v121_v18  ;;  %v127_v20 = vmul.f32 %v125_v17, %v125_v17 }
 0x1f3   :  { %v126_v21 = vsub.f32 %v193_v13, %v124_v19  ;;  %129 = vadd.xlane.f32.xlu0 %v127_v20 }
 0x1f5   :  { %v128_v22 = vmul.f32 %v126_v21, %v126_v21 }
 0x1f7   :  { %131 = vadd.xlane.f32.xlu1 %v128_v22 }
 0x280   :  { %v130_v23 = vpop.xlane.xlu0 %129 }
 0x281   :  { %v133_v24 = vmul.f32 0.0078125, %v130_v23 }
 0x283   :  { %v135_v25 = vadd.f32 1e-05, %v133_v24 }
 0x284   :  { %v132_v26 = vpop.xlane.xlu1 %131 }
 0x285   :  { %204 = vrsqrt.f32 %v135_v25  ;;  %v134_v27 = vmul.f32 0.0078125, %v132_v26 }
 0x287   :  { %v136_v28 = vadd.f32 1e-05, %v134_v27 }
 0x289   :  { %206 = vrsqrt.f32 %v136_v28 }
 0x28f   :  { %v205_v29 = vpop.eup %204 }
 0x290   :  { %v139_v31 = vmul.f32 %v205_v29, %v125_v17 }
 0x292   :  { %v148_v33 = vmul.f32 %v181_v30, %v139_v31 }
 0x293   :  { %v207_v34 = vpop.eup %206 }
 0x294   :  { %v140_v35 = vmul.f32 %v207_v34, %v126_v21  ;;  %v157_v36 = vadd.f32 %v182_v32, %v148_v33 }
 0x296   :  { %v149_v37 = vmul.f32 %v181_v30, %v140_v35  ;;  %159 = vst [vmem:[#allocation2] sm:$0xff] %v157_v36 }
 0x298   :  { %v158_v38 = vadd.f32 %v182_v32, %v149_v37 }
 0x29a   :  { %160 = vst [vmem:[#allocation2 + $0x8] sm:$0xff] %v158_v38 }
 0x29b   :  { %219 = shalt.err (!%p216_p4)
}
 0x29c   :  { %s220_s28 = scalar_lea.hbm %s296_s4, 256 }
 0x29d   :  { %p221_p5 = scmp.ne.s32.totalorder %s296_s4, %s220_s28  ;;  %p224_p6 = scmp.lt.u32.totalorder %s220_s28, %s296_s4 }
 0x29f   :  { %p226_p7 = pnand %p224_p6, %p221_p5 }
 0x2a1   :  { %229 = shalt.err (!%p226_p7)
}
 0x2a2   :  { %s235_s7 = smov 128   ;;  %s236_s8 = smov 8  }
 0x2a3   :  { %172 = dma.vmem_to_hbm [thread:$0]  %s167_s26, 256, %s296_s4, [#allocation3], %s235_s7, %s235_s7, %s236_s8  }
 0x2a4   :  { %230 = dma.done.wait [#allocation3], 256  }
 0x2a5   :  { %231 = vsyncadd [#allocation3], 4294967040 }
 0x2a6   :  { %176 = vsyncpa [#allocation3], 1 }

</bundles_post_ra>
